<compile_context>
chip_gen: v5e
topology: v5e:2x2
jax: 0.10.0
libtpu: 0.0.40
codegen_flags: <defaults>
</compile_context>

<pallas_src>
import functools

import jax
import jax.numpy as jnp
import numpy as np
from jax.experimental import pallas as pl
from jax.experimental.pallas import tpu as pltpu


# ----------------------------------------------------------------------------
# Fused decoder kernel.
#
#   rhs1_ref : (K1, Lp)        im2col of the edge-padded layer-1 input (K1=32,
#                              rows ordered tap-major then in-channel, zero-padded)
#   w1s_ref  : (Cout1, K1)     stacked (flipped) layer-1 taps
#   b1_ref   : (Cout1, 1)
#   mask_ref : (1, Lp)         1.0 on valid layer-1 output positions (zero tail)
#   w2s_ref  : (4*Cout2, 4*Cout1)  stacked polyphase layer-2 weight (zero-padded)
#   b2_ref   : (4*Cout2, 1)    layer-2 bias tiled over the 4 phases
#   o_ref    : (4*Cout2, Lp)   4 polyphase layer-2 outputs over the layer-1 grid
#   y1_ref   : (Cout1, Lp+128) VMEM scratch: masked layer-1 activations + zero tail
#   rhs2_ref : (4*Cout1, Lp)   VMEM scratch: 4 shifted y1 views stacked along K
# ----------------------------------------------------------------------------
def _decoder_kernel(rhs1_ref, w1s_ref, b1_ref, mask_ref, w2s_ref, b2_ref,
                    o_ref, y1_ref, rhs2_ref, *, Wp):
    C1 = y1_ref.shape[0]
    Lp = rhs1_ref.shape[1]

    # ---- layer 1: one lane-dense (C1, K1) @ (K1, Lp) MXU matmul + bias + ReLU;
    #      the mask zeroes padded-grid border rows/cols and the lane tail. ----
    y1 = jnp.dot(w1s_ref[...], rhs1_ref[...], preferred_element_type=jnp.float32)
    y1 = jnp.maximum(y1 + b1_ref[...], 0.0) * mask_ref[...]

    # Keep the intermediate VMEM-resident.  One full-vreg zero store on the tail
    # so the shifted polyphase views below never read uninitialised memory.
    y1_ref[:, :Lp] = y1
    y1_ref[:, Lp:] = jnp.zeros((C1, y1_ref.shape[1] - Lp), jnp.float32)

    # ---- layer 2: stack the 4 shifted polyphase views along K (sublane-aligned,
    #      lane-dense stores), then one (12, 32) @ (32, Lp) matmul. ----
    rhs2_ref[0:C1, :] = y1                                # shift 0: reuse registers
    for v, s in ((1, 1), (2, Wp), (3, Wp + 1)):
        rhs2_ref[v * C1:(v + 1) * C1, :] = y1_ref[:, s:s + Lp]

    out = jnp.dot(w2s_ref[...], rhs2_ref[...], preferred_element_type=jnp.float32)
    o_ref[...] = jnp.maximum(out + b2_ref[...], 0.0)


# ----------------------------------------------------------------------------
# One-time parameter / constant preparation (hoisted out of the forward path).
# ----------------------------------------------------------------------------
def prepare_decoder_params(params, input_shape):
    w1 = np.asarray(params["w1"], np.float32)   # (Cin1, Cout1, 3, 3)  PyTorch ConvT layout
    b1 = np.asarray(params["b1"], np.float32)
    w2 = np.asarray(params["w2"], np.float32)   # (Cout1, Cout2, 3, 3)
    b2 = np.asarray(params["b2"], np.float32)
    Cin1, Cout1, KH, KW = w1.shape
    Cout2 = w2.shape[1]
    N, _, H, W = input_shape

    pad = KH - 1 - 1                            # k=3, padding=1 -> lo = hi = 1
    Hp, Wp = H + 2 * pad, W + 2 * pad
    L = N * Hp * Wp
    Lp = ((L + 127) // 128) * 128               # lane-dense flat length (648 -> 768)
    K1 = ((KH * KW * Cin1 + 7) // 8) * 8        # layer-1 K, padded to sublane multiple

    # Layer 1: spatially flipped taps (ConvT -> forward conv), stacked along K
    # (tap-major, then in-channel), zero-padded to K1 columns.
    w1_taps = np.transpose(w1[:, :, ::-1, ::-1], (2, 3, 1, 0)).reshape(KH * KW, Cout1, Cin1)
    w1s = np.zeros((Cout1, K1), np.float32)
    w1s[:, :KH * KW * Cin1] = np.transpose(w1_taps, (1, 0, 2)).reshape(Cout1, -1)

    # Layer 2: stride-2 transposed conv decomposed into 4 polyphase components
    # folded into a single zero-padded (4*Cout2, 4*Cout1) weight.
    # Output row 2m+a reads y1 row m+dm with tap kh given by:
    #   (a=0,dm=0)->1, (a=1,dm=0)->2, (a=1,dm=1)->0   (same rule for columns).
    w2_taps = np.transpose(w2, (2, 3, 1, 0))    # (KH, KW, Cout2, Cout1), unflipped
    khmap = {(0, 0): 1, (1, 0): 2, (1, 1): 0}
    w2s = np.zeros((4 * Cout2, 4 * Cout1), np.float32)
    for a in (0, 1):
        for b in (0, 1):
            p = 2 * a + b
            for dm in (0, 1):
                for dj in (0, 1):
                    v = 2 * dm + dj
                    kh = khmap.get((a, dm))
                    kw = khmap.get((b, dj))
                    if kh is None or kw is None:
                        continue
                    w2s[p * Cout2:(p + 1) * Cout2,
                        v * Cout1:(v + 1) * Cout1] = w2_taps[kh, kw]

    # Static validity mask of layer-1 output positions in the lane-padded grid.
    m = np.zeros((N, Hp, Wp), np.float32)
    m[:, :H, :W] = 1.0
    mask = np.zeros((1, Lp), np.float32)
    mask[0, :L] = m.reshape(-1)

    return {
        "w1s": jnp.asarray(w1s),
        "b1": jnp.asarray(b1.reshape(Cout1, 1)),
        "mask": jnp.asarray(mask),
        "w2s": jnp.asarray(w2s),
        "b2": jnp.asarray(np.tile(b2.reshape(1, Cout2), (4, 1)).reshape(4 * Cout2, 1)),
    }


# ----------------------------------------------------------------------------
# Forward: minimal per-call layout plumbing + one pallas_call.
# ----------------------------------------------------------------------------
@jax.jit
def decoder_forward_pallas(x_nchw, prep):
    w1s, b1, mask, w2s, b2 = prep["w1s"], prep["b1"], prep["mask"], prep["w2s"], prep["b2"]
    Cout1, K1 = w1s.shape
    Cout2 = w2s.shape[0] // 4
    Lp = mask.shape[1]

    N, Cin, H, W = x_nchw.shape
    KH = KW = 3                                  # fixed by the module spec
    pad = KH - 1 - 1
    Hp, Wp = H + 2 * pad, W + 2 * pad
    L = N * Hp * Wp
    max_shift = (KH - 1) * Wp + (KW - 1)

    # ---- per-call input layout (one small XLA fusion): channel-major,
    #      edge-padded, flattened, im2col-stacked along K, lane-padded to Lp. ----
    x_c = jnp.transpose(x_nchw, (1, 0, 2, 3))
    xp = jnp.pad(x_c, ((0, 0), (0, 0), (pad, pad), (pad, pad)))
    x_flat = jnp.pad(xp.reshape(Cin, L), ((0, 0), (0, Lp + max_shift - L)))
    rhs1 = jnp.stack([x_flat[:, kh * Wp + kw: kh * Wp + kw + Lp]
                      for kh in range(KH) for kw in range(KW)], axis=0)
    rhs1 = jnp.pad(rhs1.reshape(KH * KW * Cin, Lp),
                   ((0, K1 - KH * KW * Cin), (0, 0)))

    phases = pl.pallas_call(
        functools.partial(_decoder_kernel, Wp=Wp),
        out_shape=jax.ShapeDtypeStruct((4 * Cout2, Lp), jnp.float32),
        in_specs=[pl.BlockSpec(memory_space=pltpu.MemorySpace.VMEM)] * 6,
        out_specs=pl.BlockSpec(memory_space=pltpu.MemorySpace.VMEM),
        scratch_shapes=[pltpu.VMEM((Cout1, Lp + 128), jnp.float32),
                        pltpu.VMEM((4 * Cout1, Lp), jnp.float32)],
    )(rhs1, w1s, b1, mask, w2s, b2)

    # ---- epilogue (one small XLA fusion): valid-region slice, 2x2 phase
    #      de-interleave, back to NCHW. ----
    ph = phases[:, :L].reshape(2, 2, Cout2, N, Hp, Wp)[:, :, :, :, :H, :W]
    out = jnp.transpose(ph, (3, 2, 4, 0, 5, 1)).reshape(N, Cout2, 2 * H, 2 * W)
    return out


# ----------------------------------------------------------------------------
# Pure-XLA reference for verification.
# ----------------------------------------------------------------------------
def _ref_convT_relu(x_nhwc, w_pt, bias, *, stride, padding, output_padding):
    Cin, Cout, KH, KW = w_pt.shape
    w_hwio = jnp.transpose(w_pt[:, :, ::-1, ::-1], (2, 3, 0, 1))
    lo = KH - 1 - padding
    hi = lo + output_padding
    y = jax.lax.conv_general_dilated(
        x_nhwc, w_hwio, window_strides=(1, 1), padding=[(lo, hi), (lo, hi)],
        lhs_dilation=(stride, stride), dimension_numbers=("NHWC", "HWIO", "NHWC"))
    return jax.nn.relu(y + bias)


@jax.jit
def decoder_forward_ref(x_nchw, params):
    x = jnp.transpose(x_nchw, (0, 2, 3, 1))
    h = _ref_convT_relu(x, params["w1"], params["b1"],
                        stride=1, padding=1, output_padding=0)
    h = _ref_convT_relu(h, params["w2"], params["b2"],
                        stride=2, padding=1, output_padding=1)
    return jnp.transpose(h, (0, 3, 1, 2))


# ----------------------------------------------------------------------------
if __name__ == "__main__":
    key = jax.random.PRNGKey(0)
    kx, k1, k2, k3, k4 = jax.random.split(key, 5)

    # PyTorch ConvTranspose2d weight layout: (in_channels, out_channels, kH, kW)
    params = {
        "w1": 0.1 * jax.random.normal(k1, (3, 8, 3, 3), jnp.float32),
        "b1": 0.1 * jax.random.normal(k2, (8,), jnp.float32),
        "w2": 0.1 * jax.random.normal(k3, (8, 3, 3, 3), jnp.float32),
        "b2": 0.1 * jax.random.normal(k4, (3,), jnp.float32),
    }
    x = jax.random.normal(kx, (2, 3, 16, 16), jnp.float32)

    # One-time setup (hoisted out of the forward path).
    prep = prepare_decoder_params(params, x.shape)

    out = jax.block_until_ready(decoder_forward_pallas(x, prep))
    ref = jax.block_until_ready(decoder_forward_ref(x, params))

    assert out.shape == (2, 3, 32, 32), out.shape
    assert np.allclose(np.asarray(out), np.asarray(ref), atol=1e-4, rtol=1e-4)

    print("KERNEL_OK")
</pallas_src>

<mosaic_0001>
module attributes {stable_mosaic.version = 11 : i64} {
  func.func @_decoder_kernel(%arg0: memref<32x768xf32, #tpu.memory_space<vmem>>, %arg1: memref<8x32xf32, #tpu.memory_space<vmem>>, %arg2: memref<8x1xf32, #tpu.memory_space<vmem>>, %arg3: memref<1x768xf32, #tpu.memory_space<vmem>>, %arg4: memref<12x32xf32, #tpu.memory_space<vmem>>, %arg5: memref<12x1xf32, #tpu.memory_space<vmem>>, %arg6: memref<12x768xf32, #tpu.memory_space<vmem>>, %arg7: memref<8x896xf32, #tpu.memory_space<vmem>>, %arg8: memref<32x768xf32, #tpu.memory_space<vmem>>) attributes {dimension_semantics = [], scalar_prefetch = 0 : i64, scratch_operands = 2 : i64, tpu.core_type = #tpu.core_type<tc>} {
    %c0 = arith.constant 0 : index
    %c0_0 = arith.constant 0 : index
    %0 = vector.load %arg1[%c0, %c0_0] : memref<8x32xf32, #tpu.memory_space<vmem>>, vector<8x32xf32>
    %c0_1 = arith.constant 0 : index
    %c0_2 = arith.constant 0 : index
    %1 = vector.load %arg0[%c0_1, %c0_2] : memref<32x768xf32, #tpu.memory_space<vmem>>, vector<32x768xf32>
    %cst = arith.constant dense<0.000000e+00> : vector<8x768xf32>
    %2 = tpu.matmul %0, %1, %cst {dimension_numbers = #tpu.dot_dimension_numbers<[1], [0], [0], [1], [0, 0, 1, 1], [], []>} : vector<8x32xf32>, vector<32x768xf32>, vector<8x768xf32> -> vector<8x768xf32>
    %c0_3 = arith.constant 0 : index
    %c0_4 = arith.constant 0 : index
    %3 = vector.load %arg2[%c0_3, %c0_4] : memref<8x1xf32, #tpu.memory_space<vmem>>, vector<8x1xf32>
    %4 = vector.broadcast %3 : vector<8x1xf32> to vector<8x768xf32>
    %5 = arith.addf %2, %4 : vector<8x768xf32>
    %cst_5 = arith.constant 0.000000e+00 : f32
    %6 = vector.broadcast %cst_5 : f32 to vector<8x768xf32>
    %7 = arith.maximumf %5, %6 : vector<8x768xf32>
    %c0_6 = arith.constant 0 : index
    %c0_7 = arith.constant 0 : index
    %8 = vector.load %arg3[%c0_6, %c0_7] : memref<1x768xf32, #tpu.memory_space<vmem>>, vector<1x768xf32>
    %9 = vector.broadcast %8 : vector<1x768xf32> to vector<8x768xf32>
    %10 = arith.mulf %7, %9 : vector<8x768xf32>
    %c0_8 = arith.constant 0 : index
    %c0_9 = arith.constant 0 : index
    %11 = vector.load %arg7[%c0_8, %c0_9] : memref<8x896xf32, #tpu.memory_space<vmem>>, vector<8x768xf32>
    tpu.vector_store %arg7[%c0_8, %c0_9], %10 {strides = array<i32>} : memref<8x896xf32, #tpu.memory_space<vmem>>, vector<8x768xf32>,
    %cst_10 = arith.constant 0.000000e+00 : f32
    %12 = vector.broadcast %cst_10 : f32 to vector<8x128xf32>
    %c0_11 = arith.constant 0 : index
    %c768 = arith.constant 768 : index
    %13 = vector.load %arg7[%c0_11, %c768] : memref<8x896xf32, #tpu.memory_space<vmem>>, vector<8x128xf32>
    tpu.vector_store %arg7[%c0_11, %c768], %12 {strides = array<i32>} : memref<8x896xf32, #tpu.memory_space<vmem>>, vector<8x128xf32>,
    %c0_12 = arith.constant 0 : index
    %c0_13 = arith.constant 0 : index
    %14 = vector.load %arg8[%c0_12, %c0_13] : memref<32x768xf32, #tpu.memory_space<vmem>>, vector<8x768xf32>
    tpu.vector_store %arg8[%c0_12, %c0_13], %10 {strides = array<i32>} : memref<32x768xf32, #tpu.memory_space<vmem>>, vector<8x768xf32>,
    %c0_14 = arith.constant 0 : index
    %c1 = arith.constant 1 : index
    %15 = vector.load %arg7[%c0_14, %c1] : memref<8x896xf32, #tpu.memory_space<vmem>>, vector<8x768xf32>
    %c8 = arith.constant 8 : index
    %c0_15 = arith.constant 0 : index
    %16 = vector.load %arg8[%c8, %c0_15] : memref<32x768xf32, #tpu.memory_space<vmem>>, vector<8x768xf32>
    tpu.vector_store %arg8[%c8, %c0_15], %15 {strides = array<i32>} : memref<32x768xf32, #tpu.memory_space<vmem>>, vector<8x768xf32>,
    %c0_16 = arith.constant 0 : index
    %c18 = arith.constant 18 : index
    %17 = vector.load %arg7[%c0_16, %c18] : memref<8x896xf32, #tpu.memory_space<vmem>>, vector<8x768xf32>
    %c16 = arith.constant 16 : index
    %c0_17 = arith.constant 0 : index
    %18 = vector.load %arg8[%c16, %c0_17] : memref<32x768xf32, #tpu.memory_space<vmem>>, vector<8x768xf32>
    tpu.vector_store %arg8[%c16, %c0_17], %17 {strides = array<i32>} : memref<32x768xf32, #tpu.memory_space<vmem>>, vector<8x768xf32>,
    %c0_18 = arith.constant 0 : index
    %c19 = arith.constant 19 : index
    %19 = vector.load %arg7[%c0_18, %c19] : memref<8x896xf32, #tpu.memory_space<vmem>>, vector<8x768xf32>
    %c24 = arith.constant 24 : index
    %c0_19 = arith.constant 0 : index
    %20 = vector.load %arg8[%c24, %c0_19] : memref<32x768xf32, #tpu.memory_space<vmem>>, vector<8x768xf32>
    tpu.vector_store %arg8[%c24, %c0_19], %19 {strides = array<i32>} : memref<32x768xf32, #tpu.memory_space<vmem>>, vector<8x768xf32>,
    %c0_20 = arith.constant 0 : index
    %c0_21 = arith.constant 0 : index
    %21 = vector.load %arg4[%c0_20, %c0_21] : memref<12x32xf32, #tpu.memory_space<vmem>>, vector<12x32xf32>
    %c0_22 = arith.constant 0 : index
    %c0_23 = arith.constant 0 : index
    %22 = vector.load %arg8[%c0_22, %c0_23] : memref<32x768xf32, #tpu.memory_space<vmem>>, vector<32x768xf32>
    %cst_24 = arith.constant dense<0.000000e+00> : vector<12x768xf32>
    %23 = tpu.matmul %21, %22, %cst_24 {dimension_numbers = #tpu.dot_dimension_numbers<[1], [0], [0], [1], [0, 0, 1, 1], [], []>} : vector<12x32xf32>, vector<32x768xf32>, vector<12x768xf32> -> vector<12x768xf32>
    %c0_25 = arith.constant 0 : index
    %c0_26 = arith.constant 0 : index
    %24 = vector.load %arg5[%c0_25, %c0_26] : memref<12x1xf32, #tpu.memory_space<vmem>>, vector<12x1xf32>
    %25 = vector.broadcast %24 : vector<12x1xf32> to vector<12x768xf32>
    %26 = arith.addf %23, %25 : vector<12x768xf32>
    %cst_27 = arith.constant 0.000000e+00 : f32
    %27 = vector.broadcast %cst_27 : f32 to vector<12x768xf32>
    %28 = arith.maximumf %26, %27 : vector<12x768xf32>
    %c0_28 = arith.constant 0 : index
    %c0_29 = arith.constant 0 : index
    %29 = vector.load %arg6[%c0_28, %c0_29] : memref<12x768xf32, #tpu.memory_space<vmem>>, vector<12x768xf32>
    tpu.vector_store %arg6[%c0_28, %c0_29], %28 {strides = array<i32>} : memref<12x768xf32, #tpu.memory_space<vmem>>, vector<12x768xf32>,
    return
  }
}

</mosaic_0001>

<bundles_post_ra>
// kernel: decoder_forward_pallas.1
= control target key start
LH: loop header
LB: loop body
LE: loop exit
PB: predicated region body
PF: predicated region fallthrough
CT: control target
= control target key end

     0   :  { %11 = vsyncpa [#allocation5], 0  ;;  %s1007_s0 = inlined_call_operand.vmem [shape: f32[32,768], index: 0, kind: input, shape index: {}]   ;;  %s1008_s1 = inlined_call_operand.hbm [shape: f32[8,32], index: 1, kind: input, shape index: {}]   ;;  %s1009_s2 = inlined_call_operand.vmem [shape: f32[8,1], index: 2, kind: input, shape index: {}]   ;;  %s1010_s3 = inlined_call_operand.hbm [shape: f32[1,768], index: 3, kind: input, shape index: {}]   ;;  %s1011_s4 = inlined_call_operand.hbm [shape: f32[12,32], index: 4, kind: input, shape index: {}]   ;;  %s1012_s5 = inlined_call_operand.vmem [shape: f32[12,1], index: 5, kind: input, shape index: {}]   ;;  %s1013_s6 = inlined_call_operand.vmem [shape: f32[12,768], index: 6, kind: output, shape index: {}]  }
   0x1   :  { %12 = vsyncpa [#allocation7], 0  ;;  %s33_s23 = sshll.u32 %s1010_s3, 4  ;;  %s759_s24 = smov [#allocation6]   ;;  %s34_s23 = int_to_ptr.hbm [resolvable:$true] %s33_s23 }
   0x2   :  { %s35_s25 = sshll.u32 %s759_s24, 4  ;;  %s20_s28 = sshll.u32 %s1008_s1, 4  ;;  %s36_s25 = int_to_ptr.vmem [resolvable:$true] %s35_s25  ;;  %s21_s28 = int_to_ptr.hbm [resolvable:$true] %s20_s28 }
   0x3   :  { %38 = dma.hbm_to_vmem [thread:$0]  %s34_s23, 96, %s36_s25, [#allocation7]  }
   0x4   :  { %s760_s29 = smov [#allocation4]   ;;  %s43_s9 = sshll.u32 %s1011_s4, 4  ;;  %s44_s9 = int_to_ptr.hbm [resolvable:$true] %s43_s9 }
   0x5   :  { %s22_s30 = sshll.u32 %s760_s29, 4  ;;  %s761_s3 = smov [#allocation8]   ;;  %s23_s30 = int_to_ptr.vmem [resolvable:$true] %s22_s30 }
   0x6   :  { %25 = dma.hbm_to_vmem [thread:$0]  %s21_s28, 128, %s23_s30, [#allocation5]  }
   0x7   :  { %s45_s10 = sshll.u32 %s761_s3, 4  ;;  %s762_s11 = smov 128   ;;  %s46_s10 = int_to_ptr.vmem [resolvable:$true] %s45_s10 }
   0x8   :  { %s763_s12 = smov 8  }
   0x9   :  { %51 = dma.hbm_to_vmem [thread:$0]  %s44_s9, 256, %s46_s10, [#allocation7], %s762_s11, %s762_s11, %s763_s12  }
   0xa   :  { %755 = dma.done.wait [#allocation5], 128  }
   0xb   :  { %756 = vsyncadd [#allocation5], 4294967168 }
   0xc   :  { %757 = dma.done.wait [#allocation7], 352  }
   0xd   :  { %758 = vsyncadd [#allocation7], 4294966944  ;;  %v764_v0 = vmov 0   ;;  %v85_v1 = vld [vmem:[%s1007_s0 + $0x90] sm:$0xff]  ;;  %v86_v2 = vld [vmem:[%s1007_s0 + $0x98] sm:$0xff]  ;;  %vm97_vm0 = vcmask 261120  }
   0xe   :  { %641 = vset.pattern.permute.xlu0 %v764_v0  ;;  %682 = vset.pattern.permute.xlu2 %v764_v0  ;;  %v79_v3 = vld [vmem:[%s1007_s0 + $0x60] sm:$0xff]  ;;  %v80_v4 = vld [vmem:[%s1007_s0 + $0x68] sm:$0xff]  ;;  %v73_v7 = vld [vmem:[%s1007_s0 + $0x30] sm:$0xff]  ;;  %s766_s9 = smov 127   ;;  %s767_s3 = smov 110   ;;  %v768_v0 = vmov 0.0  }
   0xf   :  { %113 = vmatpush.msra.mxu0 %v85_v1  ;;  %133 = vmatpush.msra.mxu1 %v86_v2  ;;  %v87_v5 = vld [vmem:[%s1007_s0 + $0xa0] sm:$0xff]  ;;  %v88_v6 = vld [vmem:[%s1007_s0 + $0xa8] sm:$0xff]  ;;  %v74_v8 = vld [vmem:[%s1007_s0 + $0x38] sm:$0xff]  ;;  %vm382_vm1 = vcmask 891904   ;;  %vm335_vm2 = vcmask 900096   ;;  %vm288_vm3 = vcmask 1039360  }
  0x10   :  { %153 = vmatpush.msra.mxu2 %v87_v5  ;;  %173 = vmatpush.msra.mxu3 %v88_v6  ;;  %v81_v9 = vld [vmem:[%s1007_s0 + $0x70] sm:$0xff]  ;;  %v82_v10 = vld [vmem:[%s1007_s0 + $0x78] sm:$0xff]  ;;  %v67_v11 = vld [vmem:[%s1007_s0] sm:$0xff] }
  0x11   :  { %114 = vmatpush.msra.mxu0 %v79_v3  ;;  %134 = vmatpush.msra.mxu1 %v80_v4  ;;  %v68_v12 = vld [vmem:[%s1007_s0 + $0x8] sm:$0xff]  ;;  %v75_v13 = vld [vmem:[%s1007_s0 + $0x40] sm:$0xff]  ;;  %v69_v16 = vld [vmem:[%s1007_s0 + $0x10] sm:$0xff] }
  0x12   :  { %154 = vmatpush.msra.mxu2 %v81_v9  ;;  %174 = vmatpush.msra.mxu3 %v82_v10  ;;  %v76_v14 = vld [vmem:[%s1007_s0 + $0x48] sm:$0xff]  ;;  %v66_v15 = vld [vmem:[#allocation4] sm:$0xff]  ;;  %v70_v17 = vld [vmem:[%s1007_s0 + $0x18] sm:$0xff] }
  0x13   :  { %115 = vmatpush.msra.mxu0 %v73_v7  ;;  %135 = vmatpush.msra.mxu1 %v74_v8  ;;  %v89_v18 = vld [vmem:[%s1007_s0 + $0xb0] sm:$0xff]  ;;  %v90_v19 = vld [vmem:[%s1007_s0 + $0xb8] sm:$0xff]  ;;  %v83_v20 = vld [vmem:[%s1007_s0 + $0x80] sm:$0xff] }
  0x14   :  { %155 = vmatpush.msra.mxu2 %v75_v13  ;;  %175 = vmatpush.msra.mxu3 %v76_v14  ;;  %v84_v21 = vld [vmem:[%s1007_s0 + $0x88] sm:$0xff]  ;;  %v91_v22 = vld [vmem:[%s1009_s2] sm:$0xff]  ;;  %v77_v23 = vld [vmem:[%s1007_s0 + $0x50] sm:$0xff] }
  0x15   :  { %116 = vmatpush.msra.mxu0 %v67_v11  ;;  %136 = vmatpush.msra.mxu1 %v68_v12  ;;  %v78_v24 = vld [vmem:[%s1007_s0 + $0x58] sm:$0xff]  ;;  %v71_v25 = vld [vmem:[%s1007_s0 + $0x20] sm:$0xff]  ;;  %v72_v26 = vld [vmem:[%s1007_s0 + $0x28] sm:$0xff]  ;;  %s765_s0 = smov 109  }
  0x16   :  { %613 = vmatmul.msk.f32.vlgmr.msra.gmra.mxu0 %vm97_vm0, %v66_v15  ;;  %614 = vmatmul.msk.f32.vlgmr.msra.gmra.mxu1 %vm97_vm0, %v66_v15  ;;  %v227_v28 = vld [vmem:[#allocation6] sm:$0x3f] }
  0x17   :  { %156 = vmatpush.msra.mxu2 %v69_v16  ;;  %176 = vmatpush.msra.mxu3 %v70_v17  ;;  %v229_v32 = vperm.slane %v227_v28, 0  ;;  %v230_v34 = vperm.slane %v227_v28, 1  ;;  %v231_v42 = vperm.slane %v227_v28, 2  ;;  %v233_v46 = vperm.slane %v227_v28, 4  ;;  %v428_v63 = vld [vmem:[%s1012_s5 + $0x8] sm:$0xf] }
  0x18   :  { %193 = vmatpush.msrb.mxu0 %v89_v18  ;;  %213 = vmatpush.msrb.mxu1 %v90_v19  ;;  %v234_v53 = vperm.slane %v227_v28, 5  ;;  %v232_v60 = vperm.slane %v227_v28, 3  ;;  %v427_v28 = vld [vmem:[%s1012_s5] sm:$0xff] }
  0x19   :  { %615 = vmatmul.msk.f32.vlgmr.msra.gmra.mxu2 %vm97_vm0, %v66_v15  ;;  %616 = vmatmul.msk.f32.vlgmr.msra.gmra.mxu3 %vm97_vm0, %v66_v15 }
  0x1a   :  { %194 = vmatpush.msrb.mxu0 %v83_v20  ;;  %214 = vmatpush.msrb.mxu1 %v84_v21 }
  0x1b   :  { %94 = vperm.xlu0 %641, %v91_v22  }
  0x1c   :  { %195 = vmatpush.msrb.mxu0 %v77_v23  ;;  %215 = vmatpush.msrb.mxu1 %v78_v24 }
  0x1e   :  { %196 = vmatpush.msrb.mxu0 %v71_v25  ;;  %216 = vmatpush.msrb.mxu1 %v72_v26 }
  0x1f   :  { %617 = vmatmul.msk.f32.vlgmr.msrb.gmra.mxu0 %vm97_vm0, %v66_v15  ;;  %618 = vmatmul.msk.f32.vlgmr.msrb.gmra.mxu1 %vm97_vm0, %v66_v15 }
  0x8d   :  { %v95_v27 = vpop.permute.xlu0 %94 }
  0x93   :  { %v118_v29 = vpop.f32.mrf.mxu0  ;;  %v138_v30 = vpop.f32.mrf.mxu1 }
  0x94   :  { %v119_v31 = vadd.f32 %v118_v29, %v95_v27  ;;  %v139_v33 = vadd.f32 %v138_v30, %v95_v27  ;;  %v401_v30 = vld [vmem:[#allocation8] sm:$0xff] }
  0x96   :  { %v221_v35 = vmax.f32 %v119_v31, 0.0  ;;  %v222_v36 = vmax.f32 %v139_v33, 0.0 }
  0x98   :  { %v894_v37 = vmul.f32 %v229_v32, %v221_v35  ;;  %v896_v38 = vmul.f32 %v230_v34, %v222_v36 }
  0x9a   :  { %v642_v39 = vpack.i.bf16 %v896_v38, %v894_v37 }
  0x9c   :  { %v158_v40 = vpop.f32.mrf.mxu2  ;;  %643 = vrot.lane.b32.xlu0 %v642_v39, %s765_s0  ;;  %v198_v43 = vpop.f32.mrf.mxu0 }
  0x9d   :  { %v159_v41 = vadd.f32 %v158_v40, %v95_v27  ;;  %v218_v44 = vpop.f32.mrf.mxu1  ;;  %v199_v45 = vadd.f32 %v198_v43, %v95_v27  ;;  %v178_v56 = vpop.f32.mrf.mxu3 }
  0x9e   :  { %v219_v47 = vadd.f32 %v218_v44, %v95_v27  ;;  %v179_v57 = vadd.f32 %v178_v56, %v95_v27  ;;  %v402_v44 = vld [vmem:[#allocation8 + $0x8] sm:$0xf] }
  0x9f   :  { %v223_v48 = vmax.f32 %v159_v41, 0.0  ;;  %v225_v49 = vmax.f32 %v199_v45, 0.0 }
  0xa0   :  { %v226_v52 = vmax.f32 %v219_v47, 0.0  ;;  %v224_v59 = vmax.f32 %v179_v57, 0.0 }
  0xa1   :  { %v901_v50 = vmul.f32 %v231_v42, %v223_v48  ;;  %v903_v51 = vmul.f32 %v233_v46, %v225_v49 }
  0xa2   :  { %v908_v55 = vmul.f32 %v234_v53, %v226_v52  ;;  %v913_v61 = vmul.f32 %v232_v60, %v224_v59 }
  0xa3   :  { %v657_v54 = vpack.i.bf16 %v903_v51, %v901_v50 }
  0xa4   :  { %278 = vrot.lane.b32.xlu0 %v901_v50, %s766_s9  ;;  %v677_v58 = vpack.i.bf16 %v908_v55, %v903_v51  ;;  %v672_v62 = vpack.i.bf16 0.0, %v908_v55 }
  0xa5   :  { %658 = vrot.lane.b32.xlu2 %v657_v54, %s767_s3  ;;  %648 = vrot.lane.b32.xlu1 %v657_v54, %s765_s0 }
  0xac   :  { %678 = vrot.lane.b32.xlu0 %v677_v58, %s766_s9 }
  0xad   :  { %663 = vrot.lane.b32.xlu2 %v642_v39, %s766_s9  ;;  %653 = vrot.lane.b32.xlu1 %v642_v39, %s767_s3 }
  0xb4   :  { %327 = vrot.lane.b32.xlu0 %v913_v61, %s767_s3 }
  0xb5   :  { %673 = vrot.lane.b32.xlu2 %v672_v62, %s767_s3  ;;  %668 = vrot.lane.b32.xlu1 %v672_v62, %s765_s0 }
  0xbc   :  { %436 = vperm.xlu0 %641, %v428_v63  }
  0xbd   :  { %374 = vrot.lane.b32.xlu2 %v913_v61, %s765_s0  ;;  %286 = vrot.lane.b32.xlu1 %v768_v0, %s766_s9 }
  0xc5   :  { %280 = vrot.lane.b32.xlu1 %v913_v61, %s766_s9  ;;  %431 = vperm.xlu2 %682, %v427_v28  }
  0xff   :  { %v924_v1 = vpop.permute.xlu2 %658 }
 0x100   :  { %v660_v17 = vunpack.i.l.bf16 %v924_v1  ;;  %v661_v25 = vunpack.i.h.bf16 %v924_v1 }
 0x107   :  { %v664_v2 = vpop.permute.xlu2 %663 }
 0x108   :  { %v666_v19 = vunpack.i.h.bf16 %v664_v2  ;;  %v665_v20 = vunpack.i.l.bf16 %v664_v2 }
 0x10a   :  { %v289_v26 = vsel %vm288_vm3, %v665_v20, %v666_v19 }
 0x10e   :  { %v644_v3 = vpop.permute.xlu0 %643 }
 0x10f   :  { %v646_v4 = vunpack.i.h.bf16 %v644_v3  ;;  %v645_v5 = vunpack.i.l.bf16 %v644_v3  ;;  %v674_v6 = vpop.permute.xlu2 %673 }
 0x110   :  { %v676_v34 = vunpack.i.h.bf16 %v674_v6  ;;  %v675_v35 = vunpack.i.l.bf16 %v674_v6 }
 0x111   :  { %v383_v7 = vsel %vm382_vm1, %v645_v5, %v646_v4 }
 0x112   :  { %457 = vmatpush.msrb.mxu2 %v383_v7 }
 0x116   :  { %v927_v8 = vpop.permute.xlu0 %278 }
 0x117   :  { %v649_v9 = vpop.permute.xlu1 %648  ;;  %v375_v12 = vpop.permute.xlu2 %374  ;;  %v290_v27 = vsel %vm288_vm3, %v666_v19, %v927_v8 }
 0x118   :  { %v651_v10 = vunpack.i.h.bf16 %v649_v9  ;;  %v650_v11 = vunpack.i.l.bf16 %v649_v9 }
 0x11a   :  { %v385_v13 = vsel %vm382_vm1, %v650_v11, %v375_v12  ;;  %v386_v14 = vsel %vm382_vm1, %v375_v12, %v651_v10  ;;  %v384_v15 = vsel %vm382_vm1, %v646_v4, %v650_v11 }
 0x11b   :  { %480 = vmatpush.msrb.mxu3 %v384_v15  ;;  %503 = vmatpush.msra.mxu0 %v385_v13 }
 0x11c   :  { %526 = vmatpush.msra.mxu1 %v386_v14 }
 0x11e   :  { %v679_v16 = vpop.permute.xlu0 %678 }
 0x11f   :  { %v654_v18 = vpop.permute.xlu1 %653  ;;  %v681_v40 = vunpack.i.h.bf16 %v679_v16  ;;  %v680_v41 = vunpack.i.l.bf16 %v679_v16 }
 0x120   :  { %v656_v21 = vunpack.i.h.bf16 %v654_v18  ;;  %v655_v22 = vunpack.i.l.bf16 %v654_v18 }
 0x121   :  { %v293_v45 = vsel %vm288_vm3, %v680_v41, %v681_v40 }
 0x122   :  { %v336_v23 = vsel %vm335_vm2, %v655_v22, %v656_v21  ;;  %v337_v24 = vsel %vm335_vm2, %v656_v21, %v660_v17 }
 0x123   :  { %458 = vmatpush.msrb.mxu2 %v336_v23  ;;  %481 = vmatpush.msrb.mxu3 %v337_v24 }
 0x125   :  { %459 = vmatpush.msrb.mxu2 %v289_v26  ;;  %482 = vmatpush.msrb.mxu3 %v290_v27 }
 0x126   :  { %v328_v29 = vpop.permute.xlu0 %327 }
 0x127   :  { %v338_v31 = vsel %vm335_vm2, %v660_v17, %v328_v29  ;;  %v339_v32 = vsel %vm335_vm2, %v328_v29, %v661_v25  ;;  %v669_v33 = vpop.permute.xlu1 %668  ;;  %460 = vmatpush.msrb.mxu2 %v894_v37  ;;  %483 = vmatpush.msrb.mxu3 %v896_v38  ;;  %v340_v37 = vsel %vm335_vm2, %v661_v25, %v675_v35 }
 0x128   :  { %v671_v36 = vunpack.i.h.bf16 %v669_v33  ;;  %v670_v39 = vunpack.i.l.bf16 %v669_v33  ;;  %619 = vmatmul.msk.f32.vlgmr.msrb.gmra.mxu2 %vm97_vm0, %v401_v30  ;;  %621 = vmatmul.msk.f32.vlgmr.msrb.gmra.mxu3 %vm97_vm0, %v401_v30  ;;  %v341_v38 = vsel %vm335_vm2, %v675_v35, %v676_v34 }
 0x129   :  { %504 = vmatpush.msra.mxu0 %v338_v31  ;;  %527 = vmatpush.msra.mxu1 %v339_v32 }
 0x12a   :  { %v387_v42 = vsel %vm382_vm1, %v651_v10, %v670_v39  ;;  %v388_v43 = vsel %vm382_vm1, %v670_v39, %v671_v36 }
 0x12b   :  { %549 = vmatpush.msra.mxu2 %v387_v42  ;;  %572 = vmatpush.msra.mxu3 %v388_v43 }
 0x12d   :  { %550 = vmatpush.msra.mxu2 %v340_v37  ;;  %573 = vmatpush.msra.mxu3 %v341_v38 }
 0x12e   :  { %v437_v58 = vpop.permute.xlu0 %436 }
 0x12f   :  { %v287_v46 = vpop.permute.xlu1 %286  ;;  %551 = vmatpush.msra.mxu2 %v293_v45 }
 0x130   :  { %620 = vmatmul.msk.f32.gmra.mxu2 %vm97_vm0, %v402_v44  ;;  %622 = vmatmul.msk.f32.gmra.mxu3 %vm97_vm0, %v402_v44  ;;  %v294_v47 = vsel %vm288_vm3, %v681_v40, %v287_v46 }
 0x131   :  { %552 = vmatpush.msra.mxu2 %v903_v51  ;;  %574 = vmatpush.msra.mxu3 %v294_v47  ;;  %v432_v51 = vpop.permute.xlu2 %431 }
 0x133   :  { %575 = vmatpush.msra.mxu3 %v908_v55 }
 0x137   :  { %v281_v48 = vpop.permute.xlu1 %280 }
 0x138   :  { %627 = vmatmul.msk.f32.vlgmr.msra.gmra.mxu2 %vm97_vm0, %v401_v30  ;;  %629 = vmatmul.msk.f32.vlgmr.msra.gmra.mxu3 %vm97_vm0, %v401_v30  ;;  %v291_v49 = vsel %vm288_vm3, %v927_v8, %v281_v48  ;;  %v292_v52 = vsel %vm288_vm3, %v281_v48, %v680_v41 }
 0x139   :  { %505 = vmatpush.msra.mxu0 %v291_v49  ;;  %528 = vmatpush.msra.mxu1 %v292_v52 }
 0x13b   :  { %506 = vmatpush.msra.mxu0 %v901_v50  ;;  %529 = vmatpush.msra.mxu1 %v913_v61 }
 0x13c   :  { %623 = vmatmul.msk.f32.vlgmr.msra.gmra.mxu0 %vm97_vm0, %v401_v30  ;;  %625 = vmatmul.msk.f32.vlgmr.msra.gmra.mxu1 %vm97_vm0, %v401_v30 }
 0x140   :  { %628 = vmatmul.msk.f32.gmra.mxu2 %vm97_vm0, %v402_v44  ;;  %630 = vmatmul.msk.f32.gmra.mxu3 %vm97_vm0, %v402_v44 }
 0x144   :  { %624 = vmatmul.msk.f32.gmra.mxu0 %vm97_vm0, %v402_v44  ;;  %626 = vmatmul.msk.f32.gmra.mxu1 %vm97_vm0, %v402_v44 }
 0x1ab   :  { %v462_v53 = vpop.f32.mrf.mxu2  ;;  %v485_v54 = vpop.f32.mrf.mxu3 }
 0x1ac   :  { %v463_v55 = vadd.f32 %v462_v53, %v432_v51  ;;  %v486_v56 = vadd.f32 %v485_v54, %v432_v51 }
 0x1ae   :  { %v583_v50 = vmax.f32 %v463_v55, 0.0  ;;  %v584_v57 = vmax.f32 %v486_v56, 0.0 }
 0x1b0   :  { %595 = vst [vmem:[%s1013_s6] sm:$0xff] %v583_v50 }
 0x1b1   :  { %596 = vst [vmem:[%s1013_s6 + $0x8] sm:$0xff] %v584_v57 }
 0x1b3   :  { %v465_v59 = vpop.f32.mrf.mxu2  ;;  %v488_v60 = vpop.f32.mrf.mxu3 }
 0x1b4   :  { %v466_v61 = vadd.f32 %v465_v59, %v437_v58  ;;  %v489_v62 = vadd.f32 %v488_v60, %v437_v58 }
 0x1b6   :  { %v589_v63 = vmax.f32 %v466_v61, 0.0  ;;  %v590_v0 = vmax.f32 %v489_v62, 0.0 }
 0x1b8   :  { %601 = vst [vmem:[%s1013_s6 + $0x30] sm:$0xf] %v589_v63 }
 0x1b9   :  { %602 = vst [vmem:[%s1013_s6 + $0x38] sm:$0xf] %v590_v0  ;;  %v508_v1 = vpop.f32.mrf.mxu0  ;;  %v531_v2 = vpop.f32.mrf.mxu1 }
 0x1ba   :  { %v509_v3 = vadd.f32 %v508_v1, %v432_v51  ;;  %v532_v4 = vadd.f32 %v531_v2, %v432_v51 }
 0x1bb   :  { %v554_v5 = vpop.f32.mrf.mxu2  ;;  %v577_v6 = vpop.f32.mrf.mxu3 }
 0x1bc   :  { %v585_v7 = vmax.f32 %v509_v3, 0.0  ;;  %v586_v8 = vmax.f32 %v532_v4, 0.0  ;;  %v555_v9 = vadd.f32 %v554_v5, %v432_v51  ;;  %v578_v10 = vadd.f32 %v577_v6, %v432_v51 }
 0x1be   :  { %597 = vst [vmem:[%s1013_s6 + $0x10] sm:$0xff] %v585_v7  ;;  %v587_v11 = vmax.f32 %v555_v9, 0.0  ;;  %v588_v12 = vmax.f32 %v578_v10, 0.0 }
 0x1bf   :  { %598 = vst [vmem:[%s1013_s6 + $0x18] sm:$0xff] %v586_v8 }
 0x1c0   :  { %599 = vst [vmem:[%s1013_s6 + $0x20] sm:$0xff] %v587_v11 }
 0x1c1   :  { %600 = vst [vmem:[%s1013_s6 + $0x28] sm:$0xff] %v588_v12  ;;  %v511_v13 = vpop.f32.mrf.mxu0  ;;  %v534_v14 = vpop.f32.mrf.mxu1 }
 0x1c2   :  { %v512_v15 = vadd.f32 %v511_v13, %v437_v58  ;;  %v535_v16 = vadd.f32 %v534_v14, %v437_v58 }
 0x1c3   :  { %v557_v17 = vpop.f32.mrf.mxu2  ;;  %v580_v18 = vpop.f32.mrf.mxu3 }
 0x1c4   :  { %v591_v19 = vmax.f32 %v512_v15, 0.0  ;;  %v592_v20 = vmax.f32 %v535_v16, 0.0  ;;  %v558_v21 = vadd.f32 %v557_v17, %v437_v58  ;;  %v581_v22 = vadd.f32 %v580_v18, %v437_v58 }
 0x1c6   :  { %603 = vst [vmem:[%s1013_s6 + $0x40] sm:$0xf] %v591_v19  ;;  %v593_v23 = vmax.f32 %v558_v21, 0.0  ;;  %v594_v24 = vmax.f32 %v581_v22, 0.0 }
 0x1c7   :  { %604 = vst [vmem:[%s1013_s6 + $0x48] sm:$0xf] %v592_v20 }
 0x1c8   :  { %605 = vst [vmem:[%s1013_s6 + $0x50] sm:$0xf] %v593_v23 }
 0x1c9   :  { %606 = vst [vmem:[%s1013_s6 + $0x58] sm:$0xf] %v594_v24 }
 0x1ca   :  { %611 = vsyncpa [#allocation5], 1 }
 0x1cb   :  { %612 = vsyncpa [#allocation7], 1 }

</bundles_post_ra>
